<compile_context>
chip_gen: v7x
topology: tpu7x:2x2x1
jax: 0.10.0
libtpu: 0.0.40
codegen_flags: <defaults>
</compile_context>

<pallas_src>
import functools

import jax
import jax.numpy as jnp
from jax import lax
from jax.experimental import pallas as pl
from jax.experimental.pallas import tpu as pltpu


def _round_up(x, m):
    return ((x + m - 1) // m) * m


# Contract x:(tm, tk) with w:(tn, tk) on the last dim of each -> (tm, tn),
# i.e. x @ w.T without materializing a transposed weight in HBM.
_DOT_DIMS = (((1,), (1,)), ((), ()))


def _kernel_acc_in_out(x_ref, w_ref, b_ref, o_ref, *, activation):
    """float32-output variant: accumulate directly into the resident o_ref."""
    k = pl.program_id(2)

    @pl.when(k == 0)
    def _init():
        o_ref[...] = jnp.zeros_like(o_ref)

    o_ref[...] += lax.dot_general(
        x_ref[...], w_ref[...], _DOT_DIMS, preferred_element_type=jnp.float32)

    @pl.when(k == pl.num_programs(2) - 1)
    def _finalize():
        o_ref[...] = activation(o_ref[...] + b_ref[...].astype(jnp.float32))


def _kernel_scratch_acc(x_ref, w_ref, b_ref, o_ref, acc_ref, *, activation):
    """Low-precision-output variant: f32 VMEM scratch accumulator."""
    k = pl.program_id(2)

    @pl.when(k == 0)
    def _init():
        acc_ref[...] = jnp.zeros_like(acc_ref)

    acc_ref[...] += lax.dot_general(
        x_ref[...], w_ref[...], _DOT_DIMS, preferred_element_type=jnp.float32)

    @pl.when(k == pl.num_programs(2) - 1)
    def _finalize():
        out = acc_ref[...] + b_ref[...].astype(jnp.float32)
        o_ref[...] = activation(out).astype(o_ref.dtype)


def linear_and_activation(x, weight, bias, activation=jax.nn.relu,
                          *, tm=512, tn=1024, tk=1024,
                          compute_dtype=jnp.bfloat16):
    """Pallas equivalent of `activation(nn.Linear(in, out)(x))`.

    x:      (batch, in_features)
    weight: (out_features, in_features)   -- PyTorch nn.Linear layout (kept!)
    bias:   (out_features,)
    `activation` must be elementwise.
    """
    M, K = x.shape
    N, K2 = weight.shape
    assert K == K2, "weight in_features must match x"
    assert bias.shape == (N,)

    out_dtype = x.dtype

    # Sublane granularity of the compute dtype (bf16 packs 2 rows per sublane).
    sub = 16 if jnp.dtype(compute_dtype).itemsize < 4 else 8

    # Clip tiles to the (aligned) problem so tiny shapes still run, while big
    # shapes get full MXU/lane-aligned tiles.
    tm = min(tm, _round_up(M, sub))
    tn = min(tn, _round_up(N, 128))
    tk = min(tk, _round_up(K, 128))

    Mp = _round_up(M, tm)

    # v7x megacore occupancy: if the whole batch fits one row tile, try to
    # expose >= 2 parallel output tiles by shrinking tn (extra VMEM goes to tk).
    if Mp // tm == 1 and _round_up(N, tn) // tn < 2 and N > 128:
        tn_half = _round_up((N + 1) // 2, 128)
        if tn_half < tn:
            tn = tn_half

    Np = _round_up(N, tn)
    Kp = _round_up(K, tk)

    # Cast to bf16 (MXU-native on v5e/v6e/v7x) and zero-pad to tile multiples.
    # Zero K-padding contributes nothing to the dot; padded M/N rows/cols are
    # sliced off after the call.  No weight transpose in the wrapper.
    xp = x.astype(compute_dtype)
    wp = weight.astype(compute_dtype)
    if (Mp, Kp) != (M, K):
        xp = jnp.pad(xp, ((0, Mp - M), (0, Kp - K)))
    if (Np, Kp) != (N, K):
        wp = jnp.pad(wp, ((0, Np - N), (0, Kp - K)))
    bias2d = jnp.pad(bias.astype(jnp.float32), (0, Np - N)).reshape(1, Np)

    grid = (Mp // tm, Np // tn, Kp // tk)

    in_specs = [
        pl.BlockSpec((tm, tk), lambda i, j, k: (i, k)),   # x tile
        pl.BlockSpec((tn, tk), lambda i, j, k: (j, k)),   # W tile, (N,K) layout
        pl.BlockSpec((1, tn), lambda i, j, k: (0, j)),    # bias slice
    ]
    out_specs = pl.BlockSpec((tm, tn), lambda i, j, k: (i, j))

    itemsize = jnp.dtype(compute_dtype).itemsize
    cost = pl.CostEstimate(
        flops=2 * Mp * Np * Kp,
        bytes_accessed=(Mp * Kp * itemsize + Np * Kp * itemsize
                        + Mp * Np * jnp.dtype(out_dtype).itemsize),
        transcendentals=0)

    compiler_params = pltpu.CompilerParams(
        dimension_semantics=("parallel", "parallel", "arbitrary"),
        vmem_limit_bytes=48 * 1024 * 1024)

    if jnp.dtype(out_dtype) == jnp.dtype(jnp.float32):
        # Output block is resident across k -> accumulate into it directly.
        kernel = functools.partial(_kernel_acc_in_out, activation=activation)
        scratch_shapes = []
    else:
        kernel = functools.partial(_kernel_scratch_acc, activation=activation)
        scratch_shapes = [pltpu.VMEM((tm, tn), jnp.float32)]

    out = pl.pallas_call(
        kernel,
        out_shape=jax.ShapeDtypeStruct((Mp, Np), out_dtype),
        grid_spec=pltpu.PrefetchScalarGridSpec(
            num_scalar_prefetch=0,
            grid=grid,
            in_specs=in_specs,
            out_specs=out_specs,
            scratch_shapes=scratch_shapes),
        compiler_params=compiler_params,
        cost_estimate=cost,
    )(xp, wp, bias2d)

    return out[:M, :N]


if __name__ == "__main__":
    # Small shapes consistent with nn.Linear(in_features, out_features).
    # TODO(synk): at sizes this tiny a fused XLA dot beats any Pallas kernel;
    # this path is meant for shapes large enough to amortize per-step overhead.
    batch, in_features, out_features = 8, 32, 64

    key = jax.random.PRNGKey(0)
    kx, kw, kb = jax.random.split(key, 3)

    bound = 1.0 / (in_features ** 0.5)
    x = jax.random.normal(kx, (batch, in_features), dtype=jnp.float32)
    weight = jax.random.uniform(
        kw, (out_features, in_features), minval=-bound, maxval=bound,
        dtype=jnp.float32)
    bias = jax.random.uniform(
        kb, (out_features,), minval=-bound, maxval=bound, dtype=jnp.float32)

    out = linear_and_activation(x, weight, bias, activation=jax.nn.relu)
    out = jax.block_until_ready(out)

    assert out.shape == (batch, out_features)
    assert out.dtype == x.dtype

    # Reference matching the kernel's math (bf16 inputs, f32 accumulate).
    ref_bf16 = jax.nn.relu(
        jnp.dot(x.astype(jnp.bfloat16), weight.astype(jnp.bfloat16).T,
                preferred_element_type=jnp.float32) + bias)
    assert jnp.allclose(out, ref_bf16, atol=1e-3, rtol=1e-3), (
        float(jnp.max(jnp.abs(out - ref_bf16))))

    # Looser sanity check vs. the full-f32 PyTorch-equivalent reference.
    ref_f32 = jax.nn.relu(x @ weight.T + bias)
    assert jnp.allclose(out, ref_f32, atol=5e-2, rtol=5e-2), (
        float(jnp.max(jnp.abs(out - ref_f32))))

    print("KERNEL_OK")
</pallas_src>

<mosaic_0001>
module attributes {stable_mosaic.version = 11 : i64} {
  func.func @_kernel_acc_in_out(%arg0: i32, %arg1: i32, %arg2: i32, %arg3: memref<16x128xbf16, #tpu.memory_space<vmem>>, %arg4: memref<128x128xbf16, #tpu.memory_space<vmem>>, %arg5: memref<1x128xf32, #tpu.memory_space<vmem>>, %arg6: memref<16x128xf32, #tpu.memory_space<vmem>>) attributes {dimension_semantics = [#tpu.dimension_semantics<parallel>, #tpu.dimension_semantics<parallel>, #tpu.dimension_semantics<arbitrary>], iteration_bounds = array<i64: 1, 1, 1>, scalar_prefetch = 0 : i64, scratch_operands = 0 : i64, tpu.core_type = #tpu.core_type<tc>, window_params = [{transform_indices = @transform_0, window_bounds = array<i64: 16, 128>}, {transform_indices = @transform_1, window_bounds = array<i64: 128, 128>}, {transform_indices = @transform_2, window_bounds = array<i64: 1, 128>}, {transform_indices = @transform_3, window_bounds = array<i64: 16, 128>}]} {
    %c0_i32 = arith.constant 0 : i32
    %0 = arith.cmpi eq, %arg2, %c0_i32 : i32
    %1 = arith.extui %0 : i1 to i32
    %c0_i32_0 = arith.constant 0 : i32
    %2 = arith.cmpi ne, %1, %c0_i32_0 : i32
    scf.if %2 {
      %cst_10 = arith.constant 0.000000e+00 : f32
      %12 = vector.broadcast %cst_10 : f32 to vector<16x128xf32>
      %c0_11 = arith.constant 0 : index
      %c0_12 = arith.constant 0 : index
      %13 = vector.load %arg6[%c0_11, %c0_12] : memref<16x128xf32, #tpu.memory_space<vmem>>, vector<16x128xf32>
      tpu.vector_store %arg6[%c0_11, %c0_12], %12 {strides = array<i32>} : memref<16x128xf32, #tpu.memory_space<vmem>>, vector<16x128xf32>,
    } else {
    }
    %c0 = arith.constant 0 : index
    %c0_1 = arith.constant 0 : index
    %3 = vector.load %arg6[%c0, %c0_1] : memref<16x128xf32, #tpu.memory_space<vmem>>, vector<16x128xf32>
    %c0_2 = arith.constant 0 : index
    %c0_3 = arith.constant 0 : index
    %4 = vector.load %arg3[%c0_2, %c0_3] : memref<16x128xbf16, #tpu.memory_space<vmem>>, vector<16x128xbf16>
    %c0_4 = arith.constant 0 : index
    %c0_5 = arith.constant 0 : index
    %5 = vector.load %arg4[%c0_4, %c0_5] : memref<128x128xbf16, #tpu.memory_space<vmem>>, vector<128x128xbf16>
    %cst = arith.constant dense<0.000000e+00> : vector<16x128xf32>
    %6 = tpu.matmul %4, %5, %cst {dimension_numbers = #tpu.dot_dimension_numbers<[1], [1], [0], [0], [0, 0, 1, 0], [], []>} : vector<16x128xbf16>, vector<128x128xbf16>, vector<16x128xf32> -> vector<16x128xf32>
    %7 = arith.addf %3, %6 : vector<16x128xf32>
    %c0_6 = arith.constant 0 : index
    %c0_7 = arith.constant 0 : index
    %8 = vector.load %arg6[%c0_6, %c0_7] : memref<16x128xf32, #tpu.memory_space<vmem>>, vector<16x128xf32>
    tpu.vector_store %arg6[%c0_6, %c0_7], %7 {strides = array<i32>} : memref<16x128xf32, #tpu.memory_space<vmem>>, vector<16x128xf32>,
    %c0_i32_8 = arith.constant 0 : i32
    %9 = arith.cmpi eq, %arg2, %c0_i32_8 : i32
    %10 = arith.extui %9 : i1 to i32
    %c0_i32_9 = arith.constant 0 : i32
    %11 = arith.cmpi ne, %10, %c0_i32_9 : i32
    scf.if %11 {
      %c0_10 = arith.constant 0 : index
      %c0_11 = arith.constant 0 : index
      %12 = vector.load %arg6[%c0_10, %c0_11] : memref<16x128xf32, #tpu.memory_space<vmem>>, vector<16x128xf32>
      %c0_12 = arith.constant 0 : index
      %c0_13 = arith.constant 0 : index
      %13 = vector.load %arg5[%c0_12, %c0_13] : memref<1x128xf32, #tpu.memory_space<vmem>>, vector<1x128xf32>
      %14 = vector.broadcast %13 : vector<1x128xf32> to vector<16x128xf32>
      %15 = arith.addf %12, %14 : vector<16x128xf32>
      %cst_14 = arith.constant 0.000000e+00 : f32
      %16 = vector.broadcast %cst_14 : f32 to vector<16x128xf32>
      %17 = arith.maximumf %15, %16 : vector<16x128xf32>
      %c0_15 = arith.constant 0 : index
      %c0_16 = arith.constant 0 : index
      %18 = vector.load %arg6[%c0_15, %c0_16] : memref<16x128xf32, #tpu.memory_space<vmem>>, vector<16x128xf32>
      tpu.vector_store %arg6[%c0_15, %c0_16], %17 {strides = array<i32>} : memref<16x128xf32, #tpu.memory_space<vmem>>, vector<16x128xf32>,
    } else {
    }
    return
  }
  func.func @transform_0(%arg0: i32, %arg1: i32, %arg2: i32) -> (i32, i32) {
    %c0_i32 = arith.constant 0 : i32
    return %arg0, %arg2 : i32, i32
  }
  func.func @transform_1(%arg0: i32, %arg1: i32, %arg2: i32) -> (i32, i32) {
    %c0_i32 = arith.constant 0 : i32
    return %arg1, %arg2 : i32, i32
  }
  func.func @transform_2(%arg0: i32, %arg1: i32, %arg2: i32) -> (i32, i32) {
    %c0_i32 = arith.constant 0 : i32
    %c0_i32_0 = arith.constant 0 : i32
    return %c0_i32, %arg1 : i32, i32
  }
  func.func @transform_3(%arg0: i32, %arg1: i32, %arg2: i32) -> (i32, i32) {
    %c0_i32 = arith.constant 0 : i32
    return %arg0, %arg1 : i32, i32
  }
}

</mosaic_0001>

<bundles_post_ra>
// kernel: tpu_custom_call.1
= control target key start
LH: loop header
LB: loop body
LE: loop exit
PB: predicated region body
PF: predicated region fallthrough
CT: control target
= control target key end

     0   :  { %8 = vsyncpa [#allocation3], 0  ;;  %s402_s0 = inlined_call_operand.hbm [shape: bf16[16,128], index: 0, kind: input, shape index: {}]   ;;  %s403_s1 = inlined_call_operand.hbm [shape: bf16[128,128], index: 1, kind: input, shape index: {}]   ;;  %s404_s2 = inlined_call_operand.vmem [shape: f32[1,128], index: 2, kind: input, shape index: {}]   ;;  %s405_s3 = inlined_call_operand.hbm [shape: f32[16,128], index: 3, kind: output, shape index: {}]  }
   0x1   :  { %9 = vsyncpa [#allocation6], 0 }
   0x2   :  { %10 = vsyncpa [#allocation4], 0  ;;  %s334_s12 = smov [#allocation2]   ;;  %s262_s16 = scalar_lea.hbm %s402_s0, 128 }
   0x3   :  { %s16_s13 = sshll.u32 %s334_s12, 4  ;;  %p263_p0 = scmp.ne.s32.totalorder %s402_s0, %s262_s16  ;;  %s17_s13 = int_to_ptr.vmem [resolvable:$true] %s16_s13 }
   0x4   :  { %p266_p1 = scmp.lt.u32.totalorder %s262_s16, %s402_s0 }
   0x6   :  { %p268_p2 = pnand %p266_p1, %p263_p0 }
   0x8   :  { %271 = shalt.err (!%p268_p2)
}
   0x9   :  { %s272_s21 = scalar_lea.vmem %s17_s13, 128  ;;  %p277_p4 = scmp.lt.s32.totalorder %s17_s13, %s17_s13 }
   0xa   :  { %p273_p3 = scmp.ne.s32.totalorder %s17_s13, %s272_s21  ;;  %p278_p5 = scmp.lt.s32.totalorder %s272_s21, %s272_s21 }
   0xc   :  { %p279_p6 = por %p278_p5, %p277_p4 }
   0xe   :  { %p280_p7 = pnand %p279_p6, %p273_p3 }
  0x10   :  { %283 = shalt.err (!%p280_p7)
}
  0x11   :  { %s335_s22 = smov 64   ;;  %s336_s23 = smov 4  }
  0x12   :  { %22 = dma.hbm_to_vmem [thread:$0]  %s402_s0, 128, %s17_s13, [#allocation3], %s335_s22, %s335_s22, %s336_s23  }
  0x13   :  { %s337_s26 = smov [#allocation5]   ;;  %s284_s30 = scalar_lea.hbm %s403_s1, 1024 }
  0x14   :  { %s28_s27 = sshll.u32 %s337_s26, 4  ;;  %p285_p8 = scmp.ne.s32.totalorder %s403_s1, %s284_s30  ;;  %s29_s27 = int_to_ptr.vmem [resolvable:$true] %s28_s27 }
  0x15   :  { %p288_p9 = scmp.lt.u32.totalorder %s284_s30, %s403_s1 }
  0x17   :  { %p290_p10 = pnand %p288_p9, %p285_p8 }
  0x19   :  { %293 = shalt.err (!%p290_p10)
}
  0x1a   :  { %s294_s8 = scalar_lea.vmem %s29_s27, 1024  ;;  %p299_p12 = scmp.lt.s32.totalorder %s29_s27, %s29_s27 }
  0x1b   :  { %p295_p11 = scmp.ne.s32.totalorder %s29_s27, %s294_s8  ;;  %p300_p13 = scmp.lt.s32.totalorder %s294_s8, %s294_s8 }
  0x1d   :  { %p301_p0 = por %p300_p13, %p299_p12 }
  0x1f   :  { %p302_p1 = pnand %p301_p0, %p295_p11 }
  0x21   :  { %305 = shalt.err (!%p302_p1)
}
  0x22   :  { %34 = dma.hbm_to_vmem [thread:$0]  %s403_s1, 1024, %s29_s27, [#allocation6], %s335_s22, %s335_s22, %s336_s23  }
  0x23   :  { %328 = dma.done.wait [#allocation3], 128  }
  0x24   :  { %329 = vsyncadd [#allocation3], 4294967168 }
  0x25   :  { %330 = dma.done.wait [#allocation6], 1024  }
  0x26   :  { %331 = vsyncadd [#allocation6], 4294966272  ;;  %v338_v0 = vmov 0.0   ;;  %vm339_vm0 = vmmov 0   ;;  %v253_v1 = vld [vmem:[#allocation5] sm:$0xff]   ;;  %v254_v2 = vld [vmem:[#allocation5 + $0x8] sm:$0xff]  }
  0x27   :  { %224 = vmatprep.subr.bf16.mxu0 %v338_v0  ;;  %240 = vmatprep.mubr.msk.bf16.mxu0 %vm339_vm0, %v338_v0  ;;  %v255_v3 = vld [vmem:[#allocation5 + $0x10] sm:$0xff]   ;;  %v256_v4 = vld [vmem:[#allocation5 + $0x18] sm:$0xff]   ;;  %v257_v5 = vld [vmem:[#allocation5 + $0x20] sm:$0xff]   ;;  %s340_s11 = smov [#allocation7]  }
  0x28   :  { %225 = vmatpush3.bf16.xpose.msra.mxu0 %v253_v1  ;;  %v258_v6 = vld [vmem:[#allocation5 + $0x28] sm:$0xff]   ;;  %v259_v7 = vld [vmem:[#allocation5 + $0x30] sm:$0xff]   ;;  %v260_v8 = vld [vmem:[#allocation5 + $0x38] sm:$0xff]   ;;  %s192_s12 = sshll.u32 %s340_s11, 4  ;;  %s193_s12 = int_to_ptr.vmem [resolvable:$true] %s192_s12 }
  0x29   :  { %226 = vmatprep.subr.bf16.mxu0 %v338_v0  ;;  %v261_v9 = vld [vmem:[#allocation2] sm:$0xff]   ;;  %s306_s13 = scalar_lea.vmem %s193_s12, 256  ;;  %p311_p3 = scmp.lt.s32.totalorder %s193_s12, %s193_s12 }
  0x2a   :  { %v214_v11 = vld [vmem:[%s404_s2] ss:$0 sm:$0xff]  ;;  %p307_p2 = scmp.ne.s32.totalorder %s193_s12, %s306_s13  ;;  %p312_p4 = scmp.lt.s32.totalorder %s306_s13, %s306_s13 }
  0x2c   :  { %p313_p5 = por %p312_p4, %p311_p3 }
  0x2e   :  { %p314_p6 = pnand %p313_p5, %p307_p2 }
  0x30   :  { %227 = vmatpush3.bf16.xpose.msra.mxu0 %v254_v2 }
  0x31   :  { %228 = vmatprep.subr.bf16.mxu0 %v338_v0 }
  0x38   :  { %229 = vmatpush3.bf16.xpose.msra.mxu0 %v255_v3 }
  0x39   :  { %230 = vmatprep.subr.bf16.mxu0 %v338_v0 }
  0x40   :  { %231 = vmatpush3.bf16.xpose.msra.mxu0 %v256_v4 }
  0x41   :  { %232 = vmatprep.subr.bf16.mxu0 %v338_v0 }
  0x48   :  { %233 = vmatpush3.bf16.xpose.msra.mxu0 %v257_v5 }
  0x49   :  { %234 = vmatprep.subr.bf16.mxu0 %v338_v0 }
  0x50   :  { %235 = vmatpush3.bf16.xpose.msra.mxu0 %v258_v6 }
  0x51   :  { %236 = vmatprep.subr.bf16.mxu0 %v338_v0 }
  0x58   :  { %237 = vmatpush3.bf16.xpose.msra.mxu0 %v259_v7 }
  0x59   :  { %238 = vmatprep.subr.bf16.mxu0 %v338_v0 }
  0x60   :  { %239 = vmatpush3.bf16.xpose.msra.mxu0 %v260_v8 }
  0x67   :  { %241 = vmatmul.mubr.bf16.vlgmr.msra.gmra.mrb[0].mxu0 %v261_v9 }
 0x13a   :  { %v158_v10 = vpop.f32.mrb[0].mxu0 }
 0x13b   :  { %v242_v12 = vpop.f32.mrb[1].mxu0  ;;  %v181_v15 = vadd.f32 %v214_v11, %v158_v10 }
 0x13c   :  { %v161_v13 = vpop.f32.mrb[2].mxu0 }
 0x13d   :  { %v243_v14 = vpop.f32.mrb[3].mxu0  ;;  %v182_v16 = vadd.f32 %v214_v11, %v161_v13  ;;  %v183_v17 = vmax.f32 %v181_v15, 0.0 }
 0x13f   :  { %v184_v18 = vmax.f32 %v182_v16, 0.0  ;;  %185 = vst [vmem:[#allocation7] sm:$0xff] %v183_v17 }
 0x141   :  { %186 = vst [vmem:[#allocation7 + $0x8] sm:$0xff] %v184_v18 }
 0x142   :  { %317 = shalt.err (!%p314_p6)
}
 0x143   :  { %s318_s15 = scalar_lea.hbm %s405_s3, 256 }
 0x144   :  { %p319_p7 = scmp.ne.s32.totalorder %s405_s3, %s318_s15  ;;  %p322_p8 = scmp.lt.u32.totalorder %s318_s15, %s405_s3 }
 0x146   :  { %p324_p9 = pnand %p322_p8, %p319_p7 }
 0x148   :  { %327 = shalt.err (!%p324_p9)
}
 0x149   :  { %s341_s20 = smov 128   ;;  %s342_s21 = smov 8  }
 0x14a   :  { %198 = dma.vmem_to_hbm [thread:$0]  %s193_s12, 256, %s405_s3, [#allocation4], %s341_s20, %s341_s20, %s342_s21  }
 0x14b   :  { %332 = dma.done.wait [#allocation4], 256  }
 0x14c   :  { %333 = vsyncadd [#allocation4], 4294967040 }
 0x14d   :  { %202 = vsyncpa [#allocation3], 1 }
 0x14e   :  { %203 = vsyncpa [#allocation6], 1 }
 0x14f   :  { %204 = vsyncpa [#allocation4], 1 }

</bundles_post_ra>
